<compile_context>
chip_gen: v7x
topology: tpu7x:2x2x1
jax: 0.10.0
libtpu: 0.0.40
codegen_flags: <defaults>
</compile_context>

<pallas_src>
import functools

import jax
import jax.numpy as jnp
from jax import lax
from jax.experimental import pallas as pl
from jax.experimental.pallas import tpu as pltpu


def _round_up(x, m):
    return (x + m - 1) // m * m


def _attention_kernel(src_ref,      # (Bb, S_pad, D_pad) bf16
                      tgt_ref,      # (Bb, tT,   D_pad) bf16
                      mask_ref,     # (Bb, 1,    S_pad) f32 additive bias (0 valid / -inf masked)
                      wlin_ref,     # (D_pad, D_pad) bf16  == linear.weight^T
                      wc_ref,       # (D_pad, D_pad) bf16  == linear_out.weight[:, :D]^T
                      wt_ref,       # (D_pad, D_pad) bf16  == linear_out.weight[:, D:]^T
                      attn_h_ref,   # (Bb, tT, D_pad) out
                      align_ref):   # (Bb, tT, S_pad) out
    Bb, tT, D_pad = tgt_ref.shape

    src = src_ref[...]                         # (Bb, S_pad, D_pad) bf16
    tgt = tgt_ref[...]                         # (Bb, tT,   D_pad) bf16

    # ---- linear(tgt): flatten Bb*tT rows into a single MXU matmul ----
    tgt2d = tgt.reshape(Bb * tT, D_pad)
    tgt_lin = jnp.dot(tgt2d, wlin_ref[...], preferred_element_type=jnp.float32)
    tgt_lin = tgt_lin.astype(jnp.bfloat16).reshape(Bb, tT, D_pad)

    # ---- scores = bmm(tgt_lin, src^T): batched matmul, contract over D (no transpose) ----
    scores = lax.dot_general(
        tgt_lin, src,
        dimension_numbers=(((2,), (2,)), ((0,), (0,))),
        preferred_element_type=jnp.float32)    # (Bb, tT, S_pad) f32

    # ---- sequence mask: one vectorized additive pass (matches masked_fill_ to -inf) ----
    # NOTE: length == 0 gives NaN rows, identical to the PyTorch reference behavior.
    scores = scores + mask_ref[...]

    # ---- softmax over src positions (f32 math, EUP reciprocal), single bf16 cast ----
    m = jnp.max(scores, axis=-1, keepdims=True)
    p = jnp.exp(scores - m)
    denom = jnp.sum(p, axis=-1, keepdims=True)
    align = (p * pl.reciprocal(denom, approx=True)).astype(jnp.bfloat16)

    # ---- context + output projection: concat([c, tgt]) @ Wout^T == c@Wc^T + tgt@Wt^T ----
    c = lax.dot_general(
        align, src,
        dimension_numbers=(((2,), (1,)), ((0,), (0,))),
        preferred_element_type=jnp.float32)    # (Bb, tT, D_pad) f32
    c2d = c.astype(jnp.bfloat16).reshape(Bb * tT, D_pad)
    attn2d = (jnp.dot(c2d, wc_ref[...], preferred_element_type=jnp.float32)
              + jnp.dot(tgt2d, wt_ref[...], preferred_element_type=jnp.float32))

    attn_h_ref[...] = attn2d.reshape(Bb, tT, D_pad).astype(attn_h_ref.dtype)
    align_ref[...] = align.astype(align_ref.dtype)


def _weight_spec(D_pad):
    # Grid-invariant weight: constant index_map; single-buffered if the installed
    # Pallas supports pipeline_mode=Buffered (saves 3*D_pad^2*2B of VMEM).
    if hasattr(pl, "Buffered"):
        try:
            return pl.BlockSpec((D_pad, D_pad), lambda b, t: (0, 0),
                                pipeline_mode=pl.Buffered(1))
        except TypeError:
            pass
    return pl.BlockSpec((D_pad, D_pad), lambda b, t: (0, 0))


@functools.partial(jax.jit, static_argnames=("out_dtype",))
def attention_general(src, tgt, src_lengths, w_linear, w_linear_out,
                      out_dtype=jnp.bfloat16):
    """src: (B,S,D) f32, tgt: (B,T,D) f32, src_lengths: (B,) int32,
       w_linear: (D,D) (out,in), w_linear_out: (D, 2D) (out,in).
       out_dtype=jnp.float32 reproduces the module's output dtype exactly;
       the bf16 default halves HBM writeback (align dominates traffic)."""
    # TODO(synk): src_lengths=None (no masking) and the 2-D "one_step" tgt path of the
    # PyTorch module are handled by the caller (reshape / full-length mask), not in-kernel.
    B, S, D = src.shape
    T = tgt.shape[1]

    # ---- one-time weight prep in XLA: transpose + split (kept out of the hot loop) ----
    w_lin_t = w_linear.T                       # (D, D): tgt @ w_lin_t == linear(tgt)
    w_c_t = w_linear_out[:, :D].T              # (D, D): acts on c
    w_t_t = w_linear_out[:, D:].T              # (D, D): acts on tgt

    # ---- padding: lane-dense (x128) last dims, (x8) sublane dims ----
    D_pad = _round_up(D, 128)
    S_pad = _round_up(S, 128)
    if T <= 128:
        T_pad = _round_up(T, 8)
        tT = T_pad
    else:
        T_pad = _round_up(T, 128)
        tT = 128

    out_bytes = jnp.dtype(out_dtype).itemsize

    # ---- generation-aware VMEM sizing ----
    try:
        vmem_cap = int(pltpu.get_tpu_info().vmem_capacity_bytes)
    except Exception:
        vmem_cap = 64 * 1024 * 1024            # conservative fallback (v7x per-TC)
    vmem_limit = min(int(vmem_cap * 0.75), 100 * 1024 * 1024)  # ~48 MiB v7x, ~96 MiB v5e/v6e

    # Per-batch-element VMEM cost of one grid step (double-buffered pipeline blocks plus a
    # rough estimate of the f32/bf16 intermediates), in bytes.
    per_b = (2 * S_pad * D_pad * 2             # src block (bf16, x2 buffers)
             + 2 * tT * D_pad * 2              # tgt block
             + 2 * S_pad * 4                   # mask bias block
             + 2 * tT * D_pad * out_bytes      # attn_h out block
             + 2 * tT * S_pad * out_bytes      # align out block
             + 3 * tT * S_pad * 4              # score / softmax f32 intermediates
             + 4 * tT * D_pad * 4)             # D-wide intermediates
    fixed = 3 * D_pad * D_pad * 2              # weights (single-buffered)
    budget = int(vmem_limit * 0.7) - fixed     # leave headroom for internal scratch

    Bb_rows = max(1, 256 // tT)                # target ~256 flattened MXU rows
    Bb_vmem = max(1, budget // per_b)
    Bb = max(1, min(B, Bb_rows, Bb_vmem))
    # Keep >= 2 batch steps when possible so megacore (parallel b axis) has work on v7x.
    if B >= 2 and Bb >= B:
        Bb = max(1, (B + 1) // 2)
    B_pad = _round_up(B, Bb)

    def pad3(x, b, r, c):
        return jnp.pad(x, ((0, b - x.shape[0]), (0, r - x.shape[1]), (0, c - x.shape[2])))

    def pad2(x, r, c):
        return jnp.pad(x, ((0, r - x.shape[0]), (0, c - x.shape[1])))

    # bf16 operands: 2x MXU throughput, half the HBM/VMEM traffic; accumulation stays f32.
    src_p = pad3(src, B_pad, S_pad, D_pad).astype(jnp.bfloat16)
    tgt_p = pad3(tgt, B_pad, T_pad, D_pad).astype(jnp.bfloat16)
    w_lin_p = pad2(w_lin_t, D_pad, D_pad).astype(jnp.bfloat16)
    w_c_p = pad2(w_c_t, D_pad, D_pad).astype(jnp.bfloat16)
    w_t_p = pad2(w_t_t, D_pad, D_pad).astype(jnp.bfloat16)

    # Additive mask bias (0 where valid, -inf where masked / padded), precomputed once.
    # Pad lengths with 1 (not 0) so padded batches don't produce all -inf (NaN) rows.
    lens_p = jnp.pad(src_lengths.astype(jnp.int32), (0, B_pad - B), constant_values=1)
    col = jnp.arange(S_pad, dtype=jnp.int32)[None, :]
    mask_bias = jnp.where(col < lens_p[:, None], 0.0, -jnp.inf).astype(jnp.float32)
    mask_bias = mask_bias.reshape(B_pad, 1, S_pad)

    grid = (B_pad // Bb, T_pad // tT)

    grid_spec = pltpu.PrefetchScalarGridSpec(
        num_scalar_prefetch=0,
        grid=grid,
        in_specs=[
            pl.BlockSpec((Bb, S_pad, D_pad), lambda b, t: (b, 0, 0)),  # src (resident over t)
            pl.BlockSpec((Bb, tT, D_pad), lambda b, t: (b, t, 0)),     # tgt
            pl.BlockSpec((Bb, 1, S_pad), lambda b, t: (b, 0, 0)),      # mask bias
            _weight_spec(D_pad),                                       # W_lin^T
            _weight_spec(D_pad),                                       # W_c^T
            _weight_spec(D_pad),                                       # W_t^T
        ],
        out_specs=[
            pl.BlockSpec((Bb, tT, D_pad), lambda b, t: (b, t, 0)),     # attn_h
            pl.BlockSpec((Bb, tT, S_pad), lambda b, t: (b, t, 0)),     # align
        ],
    )

    flops = B_pad * T_pad * (6 * D_pad * D_pad + 4 * S_pad * D_pad)
    transcendentals = B_pad * T_pad * S_pad
    bytes_accessed = (B_pad * S_pad * D_pad * 2 + B_pad * T_pad * D_pad * 2
                      + B_pad * S_pad * 4 + 3 * D_pad * D_pad * 2
                      + B_pad * T_pad * D_pad * out_bytes
                      + B_pad * T_pad * S_pad * out_bytes)

    attn_h_p, align_p = pl.pallas_call(
        _attention_kernel,
        grid_spec=grid_spec,
        out_shape=(
            jax.ShapeDtypeStruct((B_pad, T_pad, D_pad), out_dtype),
            jax.ShapeDtypeStruct((B_pad, T_pad, S_pad), out_dtype),
        ),
        compiler_params=pltpu.CompilerParams(
            dimension_semantics=("parallel", "arbitrary"),
            vmem_limit_bytes=vmem_limit,
        ),
        cost_estimate=pl.CostEstimate(
            flops=flops, transcendentals=transcendentals, bytes_accessed=bytes_accessed),
    )(src_p, tgt_p, mask_bias, w_lin_p, w_c_p, w_t_p)

    # Slice off padding.
    return attn_h_p[:B, :T, :D], align_p[:B, :T, :S]


def _reference(src, tgt, src_lengths, w_linear, w_linear_out):
    # Pure-JAX f32 reference mirroring the PyTorch forward.
    B, S, D = src.shape
    tgt_lin = jnp.einsum("btd,ed->bte", tgt, w_linear)
    scores = jnp.einsum("bte,bse->bts", tgt_lin, src)
    mask = jnp.arange(S)[None, :] < src_lengths[:, None]          # (B, S)
    scores = jnp.where(mask[:, None, :], scores, -jnp.inf)
    align = jax.nn.softmax(scores, axis=-1)
    c = jnp.einsum("bts,bsd->btd", align, src)
    concat_c = jnp.concatenate([c, tgt], axis=-1)
    attn_h = jnp.einsum("btk,dk->btd", concat_c, w_linear_out)
    return attn_h, align


if __name__ == "__main__":
    B, S, T, D = 2, 16, 8, 32
    key = jax.random.PRNGKey(0)
    k1, k2, k3, k4 = jax.random.split(key, 4)

    src = jax.random.normal(k1, (B, S, D), dtype=jnp.float32)
    tgt = jax.random.normal(k2, (B, T, D), dtype=jnp.float32)
    # Deterministic parameter init (synthetic; nn.Linear layout: (out_features, in_features)).
    w_linear = jax.random.normal(k3, (D, D), dtype=jnp.float32) * 0.05
    w_linear_out = jax.random.normal(k4, (D, 2 * D), dtype=jnp.float32) * 0.05
    src_lengths = jnp.array([S, S // 2], dtype=jnp.int32)

    attn_h, align = attention_general(src, tgt, src_lengths, w_linear, w_linear_out)
    jax.block_until_ready((attn_h, align))

    ref_h, ref_a = _reference(src, tgt, src_lengths, w_linear, w_linear_out)
    # bf16 MXU operands / bf16 outputs + approximate reciprocal -> loose tolerances.
    assert jnp.allclose(attn_h.astype(jnp.float32), ref_h, atol=3e-2, rtol=3e-2), "attn_h mismatch"
    assert jnp.allclose(align.astype(jnp.float32), ref_a, atol=2e-2, rtol=2e-2), "align mismatch"

    print("KERNEL_OK")
</pallas_src>

<mosaic_0001>
module attributes {stable_mosaic.version = 11 : i64} {
  func.func @_attention_kernel(%arg0: i32, %arg1: i32, %arg2: memref<1x128x128xbf16, #tpu.memory_space<vmem>>, %arg3: memref<1x8x128xbf16, #tpu.memory_space<vmem>>, %arg4: memref<1x1x128xf32, #tpu.memory_space<vmem>>, %arg5: memref<128x128xbf16, #tpu.memory_space<vmem>>, %arg6: memref<128x128xbf16, #tpu.memory_space<vmem>>, %arg7: memref<128x128xbf16, #tpu.memory_space<vmem>>, %arg8: memref<1x8x128xbf16, #tpu.memory_space<vmem>>, %arg9: memref<1x8x128xbf16, #tpu.memory_space<vmem>>) attributes {dimension_semantics = [#tpu.dimension_semantics<parallel>, #tpu.dimension_semantics<arbitrary>], iteration_bounds = array<i64: 2, 1>, scalar_prefetch = 0 : i64, scratch_operands = 0 : i64, tpu.core_type = #tpu.core_type<tc>, window_params = [{transform_indices = @transform_0, window_bounds = array<i64: 1, 128, 128>}, {transform_indices = @transform_1, window_bounds = array<i64: 1, 8, 128>}, {transform_indices = @transform_2, window_bounds = array<i64: 1, 1, 128>}, {pipeline_mode = #tpu.pipeline_mode<synchronous>, transform_indices = @transform_3, window_bounds = array<i64: 128, 128>}, {pipeline_mode = #tpu.pipeline_mode<synchronous>, transform_indices = @transform_4, window_bounds = array<i64: 128, 128>}, {pipeline_mode = #tpu.pipeline_mode<synchronous>, transform_indices = @transform_5, window_bounds = array<i64: 128, 128>}, {transform_indices = @transform_6, window_bounds = array<i64: 1, 8, 128>}, {transform_indices = @transform_7, window_bounds = array<i64: 1, 8, 128>}]} {
    %c0 = arith.constant 0 : index
    %c0_0 = arith.constant 0 : index
    %c0_1 = arith.constant 0 : index
    %0 = vector.load %arg2[%c0, %c0_0, %c0_1] : memref<1x128x128xbf16, #tpu.memory_space<vmem>>, vector<1x128x128xbf16>
    %c0_2 = arith.constant 0 : index
    %c0_3 = arith.constant 0 : index
    %c0_4 = arith.constant 0 : index
    %1 = vector.load %arg3[%c0_2, %c0_3, %c0_4] : memref<1x8x128xbf16, #tpu.memory_space<vmem>>, vector<1x8x128xbf16>
    %2 = vector.shape_cast %1 : vector<1x8x128xbf16> to vector<8x128xbf16>
    %c0_5 = arith.constant 0 : index
    %c0_6 = arith.constant 0 : index
    %3 = vector.load %arg5[%c0_5, %c0_6] : memref<128x128xbf16, #tpu.memory_space<vmem>>, vector<128x128xbf16>
    %cst = arith.constant dense<0.000000e+00> : vector<8x128xf32>
    %4 = tpu.matmul %2, %3, %cst {dimension_numbers = #tpu.dot_dimension_numbers<[1], [0], [0], [1], [0, 0, 1, 1], [], []>} : vector<8x128xbf16>, vector<128x128xbf16>, vector<8x128xf32> -> vector<8x128xf32>
    %5 = arith.truncf %4 : vector<8x128xf32> to vector<8x128xbf16>
    %6 = vector.shape_cast %5 : vector<8x128xbf16> to vector<1x8x128xbf16>
    %cst_7 = arith.constant dense<0.000000e+00> : vector<1x8x128xf32>
    %7 = tpu.matmul %6, %0, %cst_7 {dimension_numbers = #tpu.dot_dimension_numbers<[2], [2], [1], [1], [0, 0, 0, 1, 1, 1], [0], [0]>} : vector<1x8x128xbf16>, vector<1x128x128xbf16>, vector<1x8x128xf32> -> vector<1x8x128xf32>
    %c0_8 = arith.constant 0 : index
    %c0_9 = arith.constant 0 : index
    %c0_10 = arith.constant 0 : index
    %8 = vector.load %arg4[%c0_8, %c0_9, %c0_10] : memref<1x1x128xf32, #tpu.memory_space<vmem>>, vector<1x1x128xf32>
    %9 = vector.broadcast %8 : vector<1x1x128xf32> to vector<1x8x128xf32>
    %10 = arith.addf %7, %9 : vector<1x8x128xf32>
    %cst_11 = arith.constant dense<0xFF800000> : vector<1x8xf32>
    %11 = vector.multi_reduction <maximumf>, %10, %cst_11 [2] : vector<1x8x128xf32> to vector<1x8xf32>
    %12 = vector.shape_cast %11 : vector<1x8xf32> to vector<1x8x1xf32>
    %13 = vector.broadcast %12 : vector<1x8x1xf32> to vector<1x8x128xf32>
    %14 = arith.subf %10, %13 : vector<1x8x128xf32>
    %15 = math.exp %14 : vector<1x8x128xf32>
    %cst_12 = arith.constant dense<0.000000e+00> : vector<1x8xf32>
    %16 = vector.multi_reduction <add>, %15, %cst_12 [2] : vector<1x8x128xf32> to vector<1x8xf32>
    %17 = vector.shape_cast %16 : vector<1x8xf32> to vector<1x8x1xf32>
    %18 = tpu.reciprocal %17 {approx = true} : vector<1x8x1xf32> -> vector<1x8x1xf32>
    %19 = vector.broadcast %18 : vector<1x8x1xf32> to vector<1x8x128xf32>
    %20 = arith.mulf %15, %19 : vector<1x8x128xf32>
    %21 = arith.truncf %20 : vector<1x8x128xf32> to vector<1x8x128xbf16>
    %cst_13 = arith.constant dense<0.000000e+00> : vector<1x8x128xf32>
    %22 = tpu.matmul %21, %0, %cst_13 {dimension_numbers = #tpu.dot_dimension_numbers<[2], [1], [1], [2], [0, 0, 0, 1, 1, 2], [0], [0]>} : vector<1x8x128xbf16>, vector<1x128x128xbf16>, vector<1x8x128xf32> -> vector<1x8x128xf32>
    %23 = arith.truncf %22 : vector<1x8x128xf32> to vector<1x8x128xbf16>
    %24 = vector.shape_cast %23 : vector<1x8x128xbf16> to vector<8x128xbf16>
    %c0_14 = arith.constant 0 : index
    %c0_15 = arith.constant 0 : index
    %25 = vector.load %arg6[%c0_14, %c0_15] : memref<128x128xbf16, #tpu.memory_space<vmem>>, vector<128x128xbf16>
    %cst_16 = arith.constant dense<0.000000e+00> : vector<8x128xf32>
    %26 = tpu.matmul %24, %25, %cst_16 {dimension_numbers = #tpu.dot_dimension_numbers<[1], [0], [0], [1], [0, 0, 1, 1], [], []>} : vector<8x128xbf16>, vector<128x128xbf16>, vector<8x128xf32> -> vector<8x128xf32>
    %c0_17 = arith.constant 0 : index
    %c0_18 = arith.constant 0 : index
    %27 = vector.load %arg7[%c0_17, %c0_18] : memref<128x128xbf16, #tpu.memory_space<vmem>>, vector<128x128xbf16>
    %cst_19 = arith.constant dense<0.000000e+00> : vector<8x128xf32>
    %28 = tpu.matmul %2, %27, %cst_19 {dimension_numbers = #tpu.dot_dimension_numbers<[1], [0], [0], [1], [0, 0, 1, 1], [], []>} : vector<8x128xbf16>, vector<128x128xbf16>, vector<8x128xf32> -> vector<8x128xf32>
    %29 = arith.addf %26, %28 : vector<8x128xf32>
    %30 = vector.shape_cast %29 : vector<8x128xf32> to vector<1x8x128xf32>
    %31 = arith.truncf %30 : vector<1x8x128xf32> to vector<1x8x128xbf16>
    %c0_20 = arith.constant 0 : index
    %c0_21 = arith.constant 0 : index
    %c0_22 = arith.constant 0 : index
    %32 = vector.load %arg8[%c0_20, %c0_21, %c0_22] : memref<1x8x128xbf16, #tpu.memory_space<vmem>>, vector<1x8x128xbf16>
    tpu.vector_store %arg8[%c0_20, %c0_21, %c0_22], %31 {strides = array<i32>} : memref<1x8x128xbf16, #tpu.memory_space<vmem>>, vector<1x8x128xbf16>,
    %c0_23 = arith.constant 0 : index
    %c0_24 = arith.constant 0 : index
    %c0_25 = arith.constant 0 : index
    %33 = vector.load %arg9[%c0_23, %c0_24, %c0_25] : memref<1x8x128xbf16, #tpu.memory_space<vmem>>, vector<1x8x128xbf16>
    tpu.vector_store %arg9[%c0_23, %c0_24, %c0_25], %21 {strides = array<i32>} : memref<1x8x128xbf16, #tpu.memory_space<vmem>>, vector<1x8x128xbf16>,
    return
  }
  func.func @transform_0(%arg0: i32, %arg1: i32) -> (i32, i32, i32) {
    %c0_i32 = arith.constant 0 : i32
    %c0_i32_0 = arith.constant 0 : i32
    %c0_i32_1 = arith.constant 0 : i32
    return %arg0, %c0_i32, %c0_i32_0 : i32, i32, i32
  }
  func.func @transform_1(%arg0: i32, %arg1: i32) -> (i32, i32, i32) {
    %c0_i32 = arith.constant 0 : i32
    %c0_i32_0 = arith.constant 0 : i32
    return %arg0, %arg1, %c0_i32 : i32, i32, i32
  }
  func.func @transform_2(%arg0: i32, %arg1: i32) -> (i32, i32, i32) {
    %c0_i32 = arith.constant 0 : i32
    %c0_i32_0 = arith.constant 0 : i32
    %c0_i32_1 = arith.constant 0 : i32
    return %arg0, %c0_i32, %c0_i32_0 : i32, i32, i32
  }
  func.func @transform_3(%arg0: i32, %arg1: i32) -> (i32, i32) {
    %c0_i32 = arith.constant 0 : i32
    %c0_i32_0 = arith.constant 0 : i32
    %c0_i32_1 = arith.constant 0 : i32
    return %c0_i32, %c0_i32_0 : i32, i32
  }
  func.func @transform_4(%arg0: i32, %arg1: i32) -> (i32, i32) {
    %c0_i32 = arith.constant 0 : i32
    %c0_i32_0 = arith.constant 0 : i32
    %c0_i32_1 = arith.constant 0 : i32
    return %c0_i32, %c0_i32_0 : i32, i32
  }
  func.func @transform_5(%arg0: i32, %arg1: i32) -> (i32, i32) {
    %c0_i32 = arith.constant 0 : i32
    %c0_i32_0 = arith.constant 0 : i32
    %c0_i32_1 = arith.constant 0 : i32
    return %c0_i32, %c0_i32_0 : i32, i32
  }
  func.func @transform_6(%arg0: i32, %arg1: i32) -> (i32, i32, i32) {
    %c0_i32 = arith.constant 0 : i32
    %c0_i32_0 = arith.constant 0 : i32
    return %arg0, %arg1, %c0_i32 : i32, i32, i32
  }
  func.func @transform_7(%arg0: i32, %arg1: i32) -> (i32, i32, i32) {
    %c0_i32 = arith.constant 0 : i32
    %c0_i32_0 = arith.constant 0 : i32
    return %arg0, %arg1, %c0_i32 : i32, i32, i32
  }
}

</mosaic_0001>

<bundles_post_ra>
// kernel: attention_general.1
= control target key start
LH: loop header
LB: loop body
LE: loop exit
PB: predicated region body
PF: predicated region fallthrough
CT: control target
= control target key end

     0   :  { %13 = vsyncpa [#allocation3], 0  ;;  %s1736_s0 = inlined_call_operand.vmem [shape: bf16[2,128,128], index: 0, kind: input, shape index: {}]   ;;  %s1737_s1 = inlined_call_operand.vmem [shape: bf16[2,8,128], index: 1, kind: input, shape index: {}]   ;;  %s1738_s2 = inlined_call_operand.vmem [shape: f32[2,1,128], index: 2, kind: input, shape index: {}]   ;;  %s1739_s3 = inlined_call_operand.vmem [shape: bf16[128,128], index: 3, kind: input, shape index: {}]   ;;  %s1740_s4 = inlined_call_operand.vmem [shape: bf16[128,128], index: 4, kind: input, shape index: {}]   ;;  %s1741_s5 = inlined_call_operand.vmem [shape: bf16[128,128], index: 5, kind: input, shape index: {}]   ;;  %s1742_s6 = inlined_call_operand.hbm [shape: bf16[2,8,128], index: 6, kind: output, shape index: {0}]   ;;  %s1743_s7 = inlined_call_operand.hbm [shape: bf16[2,8,128], index: 7, kind: output, shape index: {1}]  }
   0x1   :  { %15 = vsyncpa [#allocation3 + $0x1], 0 }
   0x2   :  { %16 = vsyncpa [#allocation5], 0 }
   0x3   :  { %18 = vsyncpa [#allocation5 + $0x1], 0  ;;  %s1438_s24 = smov 0   ;;  %s1440_s25 = smov 0  }
   0x4   :  { %s1442_s26 = smov 0   ;;  %s1444_s27 = smov 0  }
   0x5   :  { %s1446_s28 = smov 0   ;;  %s1448_s29 = smov 0  }
   0x6 LB: > { %s985_s30 = sadd.s32 4294967295, %s1392_s29   ;;  %s986_s8 = sadd.s32 4294967294, %s1392_s29   ;;  %s1392_s29 = sphi %s1448_s29, %s24_s29   ;;  %s1388_s28 = sphi %s1446_s28, %s1752_s28   ;;  %s1384_s27 = sphi %s1444_s27, %s1751_s27   ;;  %s1380_s26 = sphi %s1442_s26, %s1750_s26   ;;  %s1376_s25 = sphi %s1440_s25, %s1749_s25   ;;  %s1372_s24 = sphi %s1438_s24, %s1748_s24  }
   0x7   : > { %s36_s9 = sadd.s32 1, %s1388_s28  ;;  %s188_s10 = sadd.s32 1, %s1380_s26 }
   0x8   : > { %p38_p0 = scmp.ge.s32.totalorder %s36_s9, 2  ;;  %p198_p1 = scmp.ne.s32.totalorder %s1380_s26, %s1376_s25 }
   0x9   : > { %p199_p2 = scmp.eq.s32.totalorder %s985_s30, 1  ;;  %p204_p3 = scmp.ne.s32.totalorder %s1376_s25, %s1372_s24 }
   0xa   : > { %s1754_s9 = smov (%p38_p0, %s36_s9), 0  ;;  %p205_p5 = scmp.eq.s32.totalorder %s986_s8, 1 }
   0xb   : > { %p1478_p4 = por %p199_p2, %p198_p1  ;;  %s183_s12 = ssub.s32 %s1388_s28, %s1754_s9 }
   0xc   : > { %p989_p6 = scmp.ge.s32.totalorder %s1392_s29, 1  ;;  %p186_p7 = scmp.eq.s32.totalorder %s183_s12, 0 }
   0xd   : > { %p1485_p8 = por %p205_p5, %p204_p3  ;;  %p284_p9 = scmp.lt.s32.totalorder %s1392_s29, 3 }
   0xe   : > { %s1491_s14 = scalar_select %p186_p7, %s1380_s26, %s188_s10  }
   0xf   : > { %p285_p10 = pnand %p989_p6, %p284_p9 }
  0x10   : > { %v1246_v0 = vld [vmem:[%s1739_s3] sm:$0xff] (!%p285_p10)   ;;  %v1394_v1 = vmov (!%p285_p10), 0.0   ;;  %v1247_v2 = vld [vmem:[%s1739_s3 + $0x8] sm:$0xff] (!%p285_p10)   ;;  %vm1395_vm0 = vmmov (!%p285_p10), 0   ;;  %p331_p11 = scmp.lt.s32.totalorder (!%p285_p10), %s1384_s27, 1  ;;  %v1248_v3 = vld [vmem:[%s1739_s3 + $0x10] sm:$0xff] (!%p285_p10)  }
  0x11   : > { %288 = sbr.rel (%p285_p10) target bundleno = 1233 (0x4d1), region = 44  ;;  %1080 = vmatprep.subr.bf16.mxu1 (!%p285_p10), %v1394_v1  ;;  %1120 = vmatprep.subr.bf16.mxu0 (!%p285_p10), %v1394_v1  ;;  %v1249_v5 = vld [vmem:[%s1739_s3 + $0x18] sm:$0xff] (!%p285_p10)   ;;  %v1250_v7 = vld [vmem:[%s1739_s3 + $0x20] sm:$0xff] (!%p285_p10)   ;;  %v1251_v8 = vld [vmem:[%s1739_s3 + $0x28] sm:$0xff] (!%p285_p10)   ;;  %s1578_s18 = sand.u32 (!%p285_p10), 1, %s1376_s25  }
  0x12   : > { %1081 = vmatpush3.bf16.msra.mxu1 (!%p285_p10), %v1246_v0  ;;  %1096 = vmatprep.mubr.msk.bf16.mxu1 (!%p285_p10), %vm1395_vm0, %v1394_v1  ;;  %v1252_v11 = vld [vmem:[%s1739_s3 + $0x30] sm:$0xff] (!%p285_p10)   ;;  %v1253_v13 = vld [vmem:[%s1739_s3 + $0x38] sm:$0xff] (!%p285_p10)   ;;  %v1262_v36 = vld [vmem:[%s1741_s5] sm:$0xff] (!%p285_p10)   ;;  %s1744_s23 = sshll.u32 (!%p285_p10), %s1384_s27, 6 }
  0x13   : > { %1082 = vmatprep.subr.bf16.mxu1 (!%p285_p10), %v1394_v1  ;;  %1136 = vmatprep.mubr.msk.bf16.mxu0 (!%p285_p10), %vm1395_vm0, %v1394_v1  ;;  %v1263_v38 = vld [vmem:[%s1741_s5 + $0x8] sm:$0xff] (!%p285_p10)   ;;  %v1264_v39 = vld [vmem:[%s1741_s5 + $0x10] sm:$0xff] (!%p285_p10)   ;;  %v1265_v40 = vld [vmem:[%s1741_s5 + $0x18] sm:$0xff] (!%p285_p10)   ;;  %s1660_s12 = scalar_lea.hbm (!%p285_p10), %s1743_s7, %s1744_s23 }
  0x14   : > { %v1266_v41 = vld [vmem:[%s1741_s5 + $0x20] sm:$0xff] (!%p285_p10)   ;;  %v1267_v42 = vld [vmem:[%s1741_s5 + $0x28] sm:$0xff] (!%p285_p10)   ;;  %v1268_v43 = vld [vmem:[%s1741_s5 + $0x30] sm:$0xff] (!%p285_p10)  }
  0x15   : > { %v1269_v44 = vld [vmem:[%s1741_s5 + $0x38] sm:$0xff] (!%p285_p10)   ;;  %v1270_v45 = vld [vmem:[%s1740_s4] sm:$0xff] (!%p285_p10)   ;;  %v1271_v46 = vld [vmem:[%s1740_s4 + $0x8] sm:$0xff] (!%p285_p10)  }
  0x16   : > { %1083 = vmatpush3.bf16.msra.mxu1 (!%p285_p10), %v1247_v2  ;;  %v1272_v47 = vld [vmem:[%s1740_s4 + $0x10] sm:$0xff] (!%p285_p10)   ;;  %v1273_v48 = vld [vmem:[%s1740_s4 + $0x18] sm:$0xff] (!%p285_p10)   ;;  %v1274_v49 = vld [vmem:[%s1740_s4 + $0x20] sm:$0xff] (!%p285_p10)  }
  0x17   : > { %1084 = vmatprep.subr.bf16.mxu1 (!%p285_p10), %v1394_v1  ;;  %v1275_v50 = vld [vmem:[%s1740_s4 + $0x28] sm:$0xff] (!%p285_p10)   ;;  %v1276_v51 = vld [vmem:[%s1740_s4 + $0x30] sm:$0xff] (!%p285_p10)   ;;  %v1277_v52 = vld [vmem:[%s1740_s4 + $0x38] sm:$0xff] (!%p285_p10)  }
  0x18   : > { %s1508_s19 = scalar_select %p331_p11, %s1384_s27, 1 }
  0x1a   : > { %s1034_s22 = sshll.u32 %s1508_s19, 6  ;;  %1085 = vmatpush3.bf16.msra.mxu1 %v1248_v3  ;;  %s994_s20 = sshll.u32 %s1508_s19, 2 }
  0x1b   : > { %s1518_s8 = scalar_lea.vmem %s1736_s0, %s1034_s22  ;;  %1086 = vmatprep.subr.bf16.mxu1 %v1394_v1  ;;  %s342_s15 = scalar_lea.vmem %s1737_s1, %s994_s20 }
  0x1c   : > { %v1254_v4 = vld [vmem:[%s1518_s8] sm:$0xff]   ;;  %v1255_v6 = vld [vmem:[%s1518_s8 + $0x8] sm:$0xff]   ;;  %v1256_v9 = vld [vmem:[%s1518_s8 + $0x10] sm:$0xff]   ;;  %s345_s17 = scalar_lea.vmem %s1738_s2, %s1508_s19  ;;  %s990_s19 = sshll.u32 %s1578_s18, 2 }
  0x1d   : > { %1121 = vmatpush3.bf16.msra.mxu0 %v1254_v4  ;;  %v1257_v10 = vld [vmem:[%s1518_s8 + $0x18] sm:$0xff]   ;;  %v1258_v12 = vld [vmem:[%s1518_s8 + $0x20] sm:$0xff]   ;;  %v1259_v14 = vld [vmem:[%s1518_s8 + $0x28] sm:$0xff]   ;;  %s1586_s22 = scalar_lea.vmem [#allocation4], %s990_s19 }
  0x1e   : > { %1122 = vmatprep.subr.bf16.mxu0 %v1394_v1  ;;  %1087 = vmatpush3.bf16.msra.mxu1 %v1249_v5  ;;  %v1555_v15 = vld [vmem:[%s342_s15] sm:$0xf]  ;;  %v1260_v16 = vld [vmem:[%s1518_s8 + $0x30] sm:$0xff]   ;;  %v1261_v17 = vld [vmem:[%s1518_s8 + $0x38] sm:$0xff]   ;;  %s860_s15 = sshll.u32 %s1586_s22, 4  ;;  %s832_s8 = scalar_lea.sflag [#allocation5], %s1578_s18  ;;  %s861_s15 = int_to_ptr.vmem [resolvable:$true] %s860_s15 }
  0x1f   : > { %1088 = vmatprep.subr.bf16.mxu1 %v1394_v1  ;;  %v1003_v23 = vld [vmem:[%s345_s17] ss:$0 sm:$0xff]  ;;  %s1282_s16 = scalar_lea.vmem %s861_s15, 64  ;;  %s1396_s17 = smov [#allocation4]  }
  0x20   : > { %p1283_p12 = scmp.ne.s32.totalorder %s861_s15, %s1282_s16  ;;  %s1286_s20 = sshll.u32 %s1396_s17, 4  ;;  %s1287_s20 = int_to_ptr.vmem [resolvable:$false] %s1286_s20 }
  0x21   : > { %1123 = vmatpush3.bf16.msra.mxu0 %v1255_v6  ;;  %s1288_s21 = scalar_lea.vmem %s1287_s20, 128  ;;  %p1289_p1 = scmp.lt.s32.totalorder %s861_s15, %s1287_s20 }
  0x22   : > { %1124 = vmatprep.subr.bf16.mxu0 %v1394_v1  ;;  %1089 = vmatpush3.bf16.msra.mxu1 %v1250_v7  ;;  %p1284_p13 = pnand %p1283_p12, %p1478_p4  ;;  %p1290_p2 = scmp.lt.s32.totalorder %s1288_s21, %s1282_s16 }
  0x23   : > { %1090 = vmatprep.subr.bf16.mxu1 %v1394_v1 }
  0x24   : > { %p1285_p0 = pneg %p1284_p13  ;;  %p1291_p3 = por %p1290_p2, %p1289_p1 }
  0x25   : > { %1125 = vmatpush3.bf16.msra.mxu0 %v1256_v9 }
  0x26   : > { %1126 = vmatprep.subr.bf16.mxu0 %v1394_v1  ;;  %1091 = vmatpush3.bf16.msra.mxu1 %v1251_v8  ;;  %p1292_p5 = pnand %p1291_p3, %p1285_p0 }
  0x27   : > { %1092 = vmatprep.subr.bf16.mxu1 %v1394_v1 }
  0x29   : > { %1127 = vmatpush3.bf16.msra.mxu0 %v1257_v10 }
  0x2a   : > { %1128 = vmatprep.subr.bf16.mxu0 %v1394_v1  ;;  %1093 = vmatpush3.bf16.msra.mxu1 %v1252_v11 }
  0x2b   : > { %1094 = vmatprep.subr.bf16.mxu1 %v1394_v1 }
  0x2d   : > { %1129 = vmatpush3.bf16.msra.mxu0 %v1258_v12 }
  0x2e   : > { %1130 = vmatprep.subr.bf16.mxu0 %v1394_v1  ;;  %1095 = vmatpush3.bf16.msra.mxu1 %v1253_v13 }
  0x2f   : > { %1100 = vmatprep.subr.bf16.mxu1 %v1394_v1 }
  0x31   : > { %1131 = vmatpush3.bf16.msra.mxu0 %v1259_v14  ;;  %1097 = vmatmul.mubr.bf16.vlgmr.msra.gmra.mrb[0].mxu1 %v1555_v15 }
  0x32   : > { %1132 = vmatprep.subr.bf16.mxu0 %v1394_v1  ;;  %1116 = vmatprep.mubr.msk.bf16.mxu1 %vm1395_vm0, %v1394_v1 }
  0x35   : > { %1133 = vmatpush3.bf16.msra.mxu0 %v1260_v16 }
  0x36   : > { %1134 = vmatprep.subr.bf16.mxu0 %v1394_v1 }
  0x37   : > { %1101 = vmatpush3.bf16.xpose.msra.mxu1 %v1254_v4 }
  0x38   : > { %1102 = vmatprep.subr.bf16.mxu1 %v1394_v1 }
  0x39   : > { %1135 = vmatpush3.bf16.msra.mxu0 %v1261_v17 }
  0x3a   : > { %1140 = vmatprep.subr.bf16.mxu0 %v1394_v1 }
  0x3f   : > { %1103 = vmatpush3.bf16.xpose.msra.mxu1 %v1255_v6 }
  0x40   : > { %1104 = vmatprep.subr.bf16.mxu1 %v1394_v1 }
  0x47   : > { %1105 = vmatpush3.bf16.xpose.msra.mxu1 %v1256_v9 }
  0x48   : > { %1106 = vmatprep.subr.bf16.mxu1 %v1394_v1 }
  0x4f   : > { %1107 = vmatpush3.bf16.xpose.msra.mxu1 %v1257_v10 }
  0x50   : > { %1108 = vmatprep.subr.bf16.mxu1 %v1394_v1 }
  0x57   : > { %1109 = vmatpush3.bf16.xpose.msra.mxu1 %v1258_v12 }
  0x58   : > { %1110 = vmatprep.subr.bf16.mxu1 %v1394_v1 }
  0x5f   : > { %1111 = vmatpush3.bf16.xpose.msra.mxu1 %v1259_v14 }
  0x60   : > { %1112 = vmatprep.subr.bf16.mxu1 %v1394_v1 }
  0x67   : > { %1113 = vmatpush3.bf16.xpose.msra.mxu1 %v1260_v16 }
  0x68   : > { %1114 = vmatprep.subr.bf16.mxu1 %v1394_v1 }
  0x6f   : > { %1115 = vmatpush3.bf16.xpose.msra.mxu1 %v1261_v17 }
 0x104   : > { %v462_v18 = vpop.f32.mrb[0].mxu1 }
 0x105   : > { %v468_v19 = vpack.c.bf16 %v462_v18, %v462_v18  ;;  %v1098_v20 = vpop.f32.mrb[1].mxu1 }
 0x106   : > { %v465_v21 = vpop.f32.mrb[2].mxu1 }
 0x107   : > { %v1099_v22 = vpop.f32.mrb[3].mxu1  ;;  %1117 = vmatmul.mubr.bf16.vlgmr.msra.gmra.mrb[4].mxu1 %v468_v19 }
 0x1da   : > { %v558_v24 = vpop.f32.mrb[4].mxu1 }
 0x1db   : > { %v559_v25 = vadd.f32 %v1003_v23, %v558_v24  ;;  %v1118_v26 = vpop.f32.mrb[5].mxu1 }
 0x1dc   : > { %v561_v27 = vpop.f32.mrb[6].mxu1 }
 0x1dd   : > { %564 = vmax.xlane.f32.xlu0 %v559_v25  ;;  %v1119_v28 = vpop.f32.mrb[7].mxu1 }
 0x26a   : > { %v565_v29 = vpop.xlane.xlu0 %564 }
 0x26b   : > { %v566_v30 = vsub.f32 %v559_v25, %v565_v29 }
 0x26d   : > { %v567_v31 = vmul.f32 1.442695, %v566_v30 }
 0x26f   : > { %1278 = vpow2.f32 %v567_v31 }
 0x279   : > { %v1279_v32 = vpop.eup %1278 }
 0x27a   : > { %569 = vadd.xlane.f32.xlu0 %v1279_v32 }
 0x307   : > { %v570_v33 = vpop.xlane.xlu0 %569 }
 0x308   : > { %1280 = vrcp.f32 %v570_v33 }
 0x312   : > { %v1281_v34 = vpop.eup %1280 }
 0x313   : > { %v572_v35 = vmul.f32 %v1281_v34, %v1279_v32 }
 0x315   : > { %v573_v37 = vpack.c.bf16 %v572_v35, %v572_v35 }
 0x317   : > { %1137 = vmatmul.mubr.bf16.vlgmr.msra.gmra.mrb[0].mxu0 %v573_v37  ;;  %825 = vst [vmem:[%s1586_s22] sm:$0xf] %v573_v37 }
 0x318   : > { %1141 = vmatpush3.bf16.msra.mxu0 %v1262_v36  ;;  %1156 = vmatprep.mubr.msk.bf16.mxu0 %vm1395_vm0, %v1394_v1 }
 0x319   : > { %1142 = vmatprep.subr.bf16.mxu0 %v1394_v1 }
 0x31c   : > { %1143 = vmatpush3.bf16.msra.mxu0 %v1263_v38 }
 0x31d   : > { %1144 = vmatprep.subr.bf16.mxu0 %v1394_v1 }
 0x320   : > { %1145 = vmatpush3.bf16.msra.mxu0 %v1264_v39 }
 0x321   : > { %1146 = vmatprep.subr.bf16.mxu0 %v1394_v1 }
 0x324   : > { %1147 = vmatpush3.bf16.msra.mxu0 %v1265_v40 }
 0x325   : > { %1148 = vmatprep.subr.bf16.mxu0 %v1394_v1 }
 0x328   : > { %1149 = vmatpush3.bf16.msra.mxu0 %v1266_v41 }
 0x329   : > { %1150 = vmatprep.subr.bf16.mxu0 %v1394_v1 }
 0x32c   : > { %1151 = vmatpush3.bf16.msra.mxu0 %v1267_v42 }
 0x32d   : > { %1152 = vmatprep.subr.bf16.mxu0 %v1394_v1 }
 0x330   : > { %1153 = vmatpush3.bf16.msra.mxu0 %v1268_v43 }
 0x331   : > { %1154 = vmatprep.subr.bf16.mxu0 %v1394_v1 }
 0x334   : > { %1155 = vmatpush3.bf16.msra.mxu0 %v1269_v44 }
 0x335   : > { %1160 = vmatprep.subr.bf16.mxu0 %v1394_v1 }
 0x337   : > { %1157 = vmatmul.mubr.bf16.vlgmr.msra.gmra.mrb[4].mxu0 %v1555_v15 }
 0x338   : > { %1161 = vmatpush3.bf16.msra.mxu0 %v1270_v45  ;;  %1176 = vmatprep.mubr.msk.bf16.mxu0 %vm1395_vm0, %v1394_v1 }
 0x339   : > { %1162 = vmatprep.subr.bf16.mxu0 %v1394_v1 }
 0x33c   : > { %1163 = vmatpush3.bf16.msra.mxu0 %v1271_v46 }
 0x33d   : > { %1164 = vmatprep.subr.bf16.mxu0 %v1394_v1 }
 0x340   : > { %1165 = vmatpush3.bf16.msra.mxu0 %v1272_v47 }
 0x341   : > { %1166 = vmatprep.subr.bf16.mxu0 %v1394_v1 }
 0x344   : > { %1167 = vmatpush3.bf16.msra.mxu0 %v1273_v48 }
 0x345   : > { %1168 = vmatprep.subr.bf16.mxu0 %v1394_v1 }
 0x348   : > { %1169 = vmatpush3.bf16.msra.mxu0 %v1274_v49 }
 0x349   : > { %1170 = vmatprep.subr.bf16.mxu0 %v1394_v1 }
 0x34c   : > { %1171 = vmatpush3.bf16.msra.mxu0 %v1275_v50 }
 0x34d   : > { %1172 = vmatprep.subr.bf16.mxu0 %v1394_v1 }
 0x350   : > { %1173 = vmatpush3.bf16.msra.mxu0 %v1276_v51 }
 0x351   : > { %1174 = vmatprep.subr.bf16.mxu0 %v1394_v1 }
 0x354   : > { %1175 = vmatpush3.bf16.msra.mxu0 %v1277_v52 }
 0x3ea   : > { %v608_v53 = vpop.f32.mrb[0].mxu0 }
 0x3eb   : > { %v614_v54 = vpack.c.bf16 %v608_v53, %v608_v53  ;;  %v1138_v55 = vpop.f32.mrb[1].mxu0 }
 0x3ec   : > { %v611_v56 = vpop.f32.mrb[2].mxu0 }
 0x3ed   : > { %v1139_v57 = vpop.f32.mrb[3].mxu0  ;;  %1177 = vmatmul.mubr.bf16.vlgmr.msra.gmra.mrb[4].mxu0 %v614_v54 }
 0x3ee   : > { %1295 = shalt.err (!%p1292_p5)
}
 0x3ef   : > { %s1296_s22 = scalar_lea.hbm %s1660_s12, 64  ;;  %s1300_s17 = scalar_lea.hbm %s1743_s7, 128 }
 0x3f0   : > { %p1297_p6 = scmp.ne.s32.totalorder %s1660_s12, %s1296_s22  ;;  %p1301_p10 = scmp.lt.u32.totalorder %s1660_s12, %s1743_s7 }
 0x3f1   : > { %p1302_p11 = scmp.lt.u32.totalorder %s1300_s17, %s1296_s22  ;;  %p1304_p13 = scmp.lt.u32.totalorder %s1296_s22, %s1660_s12 }
 0x3f2   : > { %p1298_p7 = pnand %p1297_p6, %p1478_p4 }
 0x3f3   : > { %p1303_p12 = por %p1302_p11, %p1301_p10 }
 0x3f4   : > { %p1299_p9 = pneg %p1298_p7 }
 0x3f5   : > { %p1305_p0 = por %p1304_p13, %p1303_p12 }
 0x3f7   : > { %p1306_p1 = pnand %p1305_p0, %p1299_p9 }
 0x3f9   : > { %1309 = shalt.err (!%p1306_p1)
}
 0x3fa   : > { %1185 = dma.vmem_to_hbm [thread:$0]  (%p1478_p4), %s861_s15, 64, %s1660_s12, %s832_s8  }
 0x3fb   : > { %s323_s16 = scalar_lea.vmem [#allocation2], %s990_s19  ;;  %s1747_s23 = sshll.u32 %s1384_s27, 6 }
 0x3fc   : > { %s846_s21 = sshll.u32 %s323_s16, 4  ;;  %s1688_s10 = scalar_lea.hbm %s1742_s6, %s1747_s23  ;;  %s1690_s21 = int_to_ptr.vmem [resolvable:$true] %s846_s21 }
 0x3fd   : > { %s827_s12 = scalar_lea.sflag [#allocation3], %s1578_s18  ;;  %s1310_s19 = scalar_lea.vmem %s1690_s21, 64 }
 0x3fe   : > { %p1311_p2 = scmp.ne.s32.totalorder %s1690_s21, %s1310_s19  ;;  %s1397_s27 = smov [#allocation2]  }
 0x3ff   : > { %s1314_s15 = sshll.u32 %s1397_s27, 4  ;;  %s1315_s15 = int_to_ptr.vmem [resolvable:$false] %s1314_s15 }
 0x400   : > { %p1312_p3 = pnand %p1311_p2, %p1478_p4  ;;  %s1316_s8 = scalar_lea.vmem %s1315_s15, 128 }
 0x401   : > { %p1317_p6 = scmp.lt.s32.totalorder %s1690_s21, %s1315_s15  ;;  %p1318_p7 = scmp.lt.s32.totalorder %s1316_s8, %s1310_s19 }
 0x402   : > { %p1313_p5 = pneg %p1312_p3 }
 0x403   : > { %p1319_p9 = por %p1318_p7, %p1317_p6 }
 0x405   : > { %p1320_p10 = pnand %p1319_p9, %p1313_p5 }
 0x4c0   : > { %v817_v58 = vpop.f32.mrb[4].mxu0 }
 0x4c1   : > { %v823_v59 = vpack.c.bf16 %v817_v58, %v817_v58  ;;  %v1178_v60 = vpop.f32.mrb[5].mxu0 }
 0x4c2   : > { %v820_v61 = vpop.f32.mrb[6].mxu0 }
 0x4c3   : > { %824 = vst [vmem:[%s323_s16] sm:$0xf] %v823_v59  ;;  %v1179_v62 = vpop.f32.mrb[7].mxu0 }
 0x4c4   : > { %1323 = shalt.err (!%p1320_p10)
}
 0x4c5   : > { %s1324_s18 = scalar_lea.hbm %s1688_s10, 64  ;;  %s1328_s16 = scalar_lea.hbm %s1742_s6, 128 }
 0x4c6   : > { %p1325_p11 = scmp.ne.s32.totalorder %s1688_s10, %s1324_s18  ;;  %p1329_p0 = scmp.lt.u32.totalorder %s1688_s10, %s1742_s6 }
 0x4c7   : > { %p1330_p1 = scmp.lt.u32.totalorder %s1328_s16, %s1324_s18  ;;  %p1332_p3 = scmp.lt.u32.totalorder %s1324_s18, %s1688_s10 }
 0x4c8   : > { %p1326_p12 = pnand %p1325_p11, %p1478_p4 }
 0x4c9   : > { %p1331_p2 = por %p1330_p1, %p1329_p0 }
 0x4ca   : > { %p1327_p13 = pneg %p1326_p12 }
 0x4cb   : > { %p1333_p5 = por %p1332_p3, %p1331_p2 }
 0x4cd   : > { %p1334_p6 = pnand %p1333_p5, %p1327_p13 }
 0x4cf   : > { %1337 = shalt.err (!%p1334_p6)
}
 0x4d0   : > { %1184 = dma.vmem_to_hbm [thread:$0]  (%p1478_p4), %s1690_s21, 64, %s1688_s10, %s827_s12  }
 0x4d1 PF: > { %p1195_p7 = scmp.ge.s32.totalorder %s1392_s29, 2  ;;  %s872_s22 = sand.u32 1, %s1372_s24  }
 0x4d2   : > { %s873_s19 = scalar_lea.sflag [#allocation3], %s872_s22 }
 0x4d3   : > { %p1189_p9 = pnand %p1195_p7, %p1485_p8 }
 0x4d5   : > { %1363 = dma.done.wait (!%p1189_p9), %s873_s19, 64  }
 0x4d6   : > { %1365 = vsyncadd (!%p1189_p9), %s873_s19, 4294967232  ;;  %s882_s27 = scalar_lea.sflag [#allocation5], %s872_s22 }
 0x4d7   : > { %1367 = dma.done.wait (!%p1189_p9), %s882_s27, 64  }
 0x4d8   : > { %1369 = vsyncadd (!%p1189_p9), %s882_s27, 4294967232  ;;  %s24_s29 = sadd.s32 1, %s1392_s29   ;;  %s1748_s24 = smov %s1376_s25 }
 0x4d9   : > { %p21_p10 = scmp.ge.s32.totalorder %s24_s29, 4   ;;  %s1749_s25 = smov %s1380_s26 }
 0x4da   : > { %s1750_s26 = smov %s1491_s14  ;;  %s1751_s27 = smov %s1388_s28 }
 0x4db   : > { %s1752_s28 = smov %s1754_s9  ;;  %23 = sbr.rel (!%p21_p10) target bundleno = 6 (0x6), region = 102 }
 0x4e2   :  { %887 = vsyncpa [#allocation3], 1 }
 0x4e3   :  { %889 = vsyncpa [#allocation3 + $0x1], 1 }
 0x4e4   :  { %890 = vsyncpa [#allocation5], 1 }
 0x4e5   :  { %892 = vsyncpa [#allocation5 + $0x1], 1 }

</bundles_post_ra>
